<compile_context>
chip_gen: v6e
topology: v6e:2x2x1
jax: 0.10.0
libtpu: 0.0.40
codegen_flags: <defaults>
</compile_context>

<pallas_src>
import functools

import jax
import jax.numpy as jnp
from jax.experimental import pallas as pl
from jax.experimental.pallas import tpu as pltpu


def _gdice_partial_kernel(x_ref, t_ref, sum_t_ref, sum_s_ref, sum_i_ref,
                          acc_ref, *, tile_h):
    # x_ref, t_ref: (TILE_H, W) channel-0 tile of batch element n, row-tile h.
    h = pl.program_id(1)

    @pl.when(h == 0)
    def _():
        acc_ref[...] = jnp.zeros_like(acc_ref)

    x = x_ref[...].astype(jnp.float32)
    t = t_ref[...].astype(jnp.float32)
    # sigmoid(x) == 0.5 * (tanh(0.5 * x) + 1): one EUP op instead of exp+recip.
    score = 0.5 * jnp.tanh(0.5 * x) + 0.5

    if tile_h % 8 == 0:
        # Pure-VPU row folding: collapse TILE_H rows onto 8 sublanes
        # (adds across vregs only; no cross-lane/sublane shuffles per step).
        def fold(a):
            return a.reshape(tile_h // 8, 8, -1).sum(axis=0)
    else:
        # Fallback for odd row counts (full-H block): small sublane reduce.
        def fold(a):
            return a.sum(axis=0, keepdims=True)

    acc_ref[0] += fold(t)            # partial sum(target)
    acc_ref[1] += fold(score)        # partial sum(score)
    acc_ref[2] += fold(score * t)    # partial sum(score * target)

    @pl.when(h == pl.num_programs(1) - 1)
    def _():
        # Single cross-lane reduction per batch element.
        sum_t_ref[...] = jnp.sum(acc_ref[0]).reshape(1, 1, 1)
        sum_s_ref[...] = jnp.sum(acc_ref[1]).reshape(1, 1, 1)
        sum_i_ref[...] = jnp.sum(acc_ref[2]).reshape(1, 1, 1)


def _pick_tile_h(H, W, itemsize=4, target_block_bytes=2 * 1024 * 1024):
    """Largest row-tile that divides H, is a multiple of 8 (or == H), and keeps
    one input block near target_block_bytes so 2 inputs x 2 pipeline buffers
    stays well inside VMEM on every generation (incl. v7x's 64 MiB)."""
    max_rows = max(8, target_block_bytes // max(1, W * itemsize))
    if H <= max_rows:
        return H
    best = 0
    th = 8
    while th <= max_rows:
        if H % th == 0:
            best = th
        th += 8
    if best:
        return best
    # TODO(synk): ragged H with no multiple-of-8 divisor falls back to a single
    # full-H block (could be masked instead for pathological prime H).
    return H


def gdice_loss_binary(inputs, target, sigmoid=True):
    """inputs, target: (N, C, H, W), any float/int dtype. Returns f32 scalar."""
    assert inputs.shape == target.shape, (
        f"predict {inputs.shape} & target {target.shape} shape do not match")
    if not sigmoid:
        # TODO(synk): only the default sigmoid=True hot path is implemented
        # in-kernel (the PyTorch module's sigmoid=False branch is not).
        raise NotImplementedError("only sigmoid=True path implemented in-kernel")

    N, C, H, W = inputs.shape
    tile_h = _pick_tile_h(H, W)
    assert H % tile_h == 0
    n_h = H // tile_h
    sub = 8 if tile_h % 8 == 0 else 1

    kernel = functools.partial(_gdice_partial_kernel, tile_h=tile_h)

    out_struct = jax.ShapeDtypeStruct((N, 1, 1), jnp.float32)
    out_spec = pl.BlockSpec((1, 1, 1), lambda n, h: (n, 0, 0))
    in_spec = pl.BlockSpec((pl.Squeezed(), pl.Squeezed(), tile_h, W),
                           lambda n, h: (n, 0, h, 0))

    sum_t, sum_s, sum_i = pl.pallas_call(
        kernel,
        out_shape=(out_struct, out_struct, out_struct),
        grid_spec=pltpu.PrefetchScalarGridSpec(
            num_scalar_prefetch=0,
            grid=(N, n_h),
            in_specs=[in_spec, in_spec],
            out_specs=(out_spec, out_spec, out_spec),
            scratch_shapes=[
                pltpu.VMEM((3, sub, W), jnp.float32),  # lane-parallel partials
            ],
        ),
        compiler_params=pltpu.CompilerParams(
            # N is independent (megacore on v7x); the H-tile axis is a reduction.
            dimension_semantics=("parallel", "arbitrary"),
            vmem_limit_bytes=32 * 1024 * 1024,
        ),
    )(inputs, target)

    # Tiny cross-batch / cross-core combine + loss formula in plain JAX.
    t_sum = jnp.sum(sum_t)
    s_sum = jnp.sum(sum_s)
    i_sum = jnp.sum(sum_i)

    smooth = jnp.float32(1.0)
    weight = 1.0 / (t_sum * t_sum + smooth)
    intersect = i_sum * weight
    dominator = (s_sum + t_sum) * weight + smooth
    return (1.0 - 2.0 * (intersect / dominator)).astype(jnp.float32)


def _gdice_loss_binary_ref(inputs, target):
    # Pure-JAX reference mirroring the PyTorch module exactly.
    score = jax.nn.sigmoid(inputs.astype(jnp.float32))[:, 0]
    tgt = target[:, 0].astype(jnp.float32)
    smooth = 1.0
    weight = 1.0 / (tgt.sum() * tgt.sum() + smooth)
    intersect = jnp.sum(score * tgt) * weight
    dominator = jnp.sum(score + tgt) * weight + smooth
    return 1.0 - 2.0 * (intersect / dominator)


if __name__ == "__main__":
    key = jax.random.PRNGKey(0)
    k1, k2 = jax.random.split(key)
    N, C, H, W = 2, 4, 16, 16
    inputs = jax.random.normal(k1, (N, C, H, W), dtype=jnp.float32)
    # Binary target (0/1), as expected by a dice loss.
    target = (jax.random.uniform(k2, (N, C, H, W)) > 0.5).astype(jnp.float32)

    loss = gdice_loss_binary(inputs, target)
    loss = jax.block_until_ready(loss)

    ref = _gdice_loss_binary_ref(inputs, target)
    assert jnp.allclose(loss, ref, atol=1e-5, rtol=1e-5), (loss, ref)
    print("KERNEL_OK")
</pallas_src>

<mosaic_0001>
module attributes {stable_mosaic.version = 11 : i64} {
  func.func @_gdice_partial_kernel(%arg0: i32, %arg1: i32, %arg2: memref<1x1x16x16xf32, #tpu.memory_space<vmem>>, %arg3: memref<1x1x16x16xf32, #tpu.memory_space<vmem>>, %arg4: memref<1x1x1xf32, #tpu.memory_space<vmem>>, %arg5: memref<1x1x1xf32, #tpu.memory_space<vmem>>, %arg6: memref<1x1x1xf32, #tpu.memory_space<vmem>>, %arg7: memref<3x8x16xf32, #tpu.memory_space<vmem>>) attributes {dimension_semantics = [#tpu.dimension_semantics<parallel>, #tpu.dimension_semantics<arbitrary>], iteration_bounds = array<i64: 2, 1>, scalar_prefetch = 0 : i64, scratch_operands = 1 : i64, tpu.core_type = #tpu.core_type<tc>, window_params = [{transform_indices = @transform_0, window_bounds = array<i64: 1, 1, 16, 16>}, {transform_indices = @transform_1, window_bounds = array<i64: 1, 1, 16, 16>}, {transform_indices = @transform_2, window_bounds = array<i64: 1, 1, 1>}, {transform_indices = @transform_3, window_bounds = array<i64: 1, 1, 1>}, {transform_indices = @transform_4, window_bounds = array<i64: 1, 1, 1>}]} {
    %c0_i32 = arith.constant 0 : i32
    %0 = arith.cmpi eq, %arg1, %c0_i32 : i32
    %1 = arith.extui %0 : i1 to i32
    %c0_i32_0 = arith.constant 0 : i32
    %2 = arith.cmpi ne, %1, %c0_i32_0 : i32
    scf.if %2 {
      %cst_31 = arith.constant 0.000000e+00 : f32
      %42 = vector.broadcast %cst_31 : f32 to vector<3x8x16xf32>
      %c0_32 = arith.constant 0 : index
      %c0_33 = arith.constant 0 : index
      %c0_34 = arith.constant 0 : index
      %43 = vector.load %arg7[%c0_32, %c0_33, %c0_34] : memref<3x8x16xf32, #tpu.memory_space<vmem>>, vector<3x8x16xf32>
      tpu.vector_store %arg7[%c0_32, %c0_33, %c0_34], %42 {strides = array<i32>} : memref<3x8x16xf32, #tpu.memory_space<vmem>>, vector<3x8x16xf32>,
    } else {
    }
    %c0 = arith.constant 0 : index
    %c0_1 = arith.constant 0 : index
    %c0_2 = arith.constant 0 : index
    %c0_3 = arith.constant 0 : index
    %3 = vector.load %arg2[%c0, %c0_1, %c0_2, %c0_3] : memref<1x1x16x16xf32, #tpu.memory_space<vmem>>, vector<1x1x16x16xf32>
    %4 = vector.shape_cast %3 : vector<1x1x16x16xf32> to vector<16x16xf32>
    %c0_4 = arith.constant 0 : index
    %c0_5 = arith.constant 0 : index
    %c0_6 = arith.constant 0 : index
    %c0_7 = arith.constant 0 : index
    %5 = vector.load %arg3[%c0_4, %c0_5, %c0_6, %c0_7] : memref<1x1x16x16xf32, #tpu.memory_space<vmem>>, vector<1x1x16x16xf32>
    %6 = vector.shape_cast %5 : vector<1x1x16x16xf32> to vector<16x16xf32>
    %cst = arith.constant 5.000000e-01 : f32
    %7 = vector.broadcast %cst : f32 to vector<16x16xf32>
    %8 = arith.mulf %7, %4 : vector<16x16xf32>
    %9 = math.tanh %8 : vector<16x16xf32>
    %cst_8 = arith.constant 5.000000e-01 : f32
    %10 = vector.broadcast %cst_8 : f32 to vector<16x16xf32>
    %11 = arith.mulf %10, %9 : vector<16x16xf32>
    %cst_9 = arith.constant 5.000000e-01 : f32
    %12 = vector.broadcast %cst_9 : f32 to vector<16x16xf32>
    %13 = arith.addf %11, %12 : vector<16x16xf32>
    %c0_10 = arith.constant 0 : index
    %c0_11 = arith.constant 0 : index
    %c0_12 = arith.constant 0 : index
    %14 = vector.load %arg7[%c0_10, %c0_11, %c0_12] : memref<3x8x16xf32, #tpu.memory_space<vmem>>, vector<1x8x16xf32>
    %15 = vector.shape_cast %14 : vector<1x8x16xf32> to vector<8x16xf32>
    %16 = vector.shape_cast %6 : vector<16x16xf32> to vector<2x8x16xf32>
    %cst_13 = arith.constant dense<0.000000e+00> : vector<8x16xf32>
    %17 = vector.multi_reduction <add>, %16, %cst_13 [0] : vector<2x8x16xf32> to vector<8x16xf32>
    %18 = arith.addf %15, %17 : vector<8x16xf32>
    %c0_14 = arith.constant 0 : index
    %c0_15 = arith.constant 0 : index
    %c0_16 = arith.constant 0 : index
    %19 = vector.load %arg7[%c0_14, %c0_15, %c0_16] : memref<3x8x16xf32, #tpu.memory_space<vmem>>, vector<1x8x16xf32>
    %20 = vector.shape_cast %19 : vector<1x8x16xf32> to vector<8x16xf32>
    %21 = vector.shape_cast %18 : vector<8x16xf32> to vector<1x8x16xf32>
    tpu.vector_store %arg7[%c0_14, %c0_15, %c0_16], %21 {strides = array<i32>} : memref<3x8x16xf32, #tpu.memory_space<vmem>>, vector<1x8x16xf32>,
    %c1 = arith.constant 1 : index
    %c0_17 = arith.constant 0 : index
    %c0_18 = arith.constant 0 : index
    %22 = vector.load %arg7[%c1, %c0_17, %c0_18] : memref<3x8x16xf32, #tpu.memory_space<vmem>>, vector<1x8x16xf32>
    %23 = vector.shape_cast %22 : vector<1x8x16xf32> to vector<8x16xf32>
    %24 = vector.shape_cast %13 : vector<16x16xf32> to vector<2x8x16xf32>
    %cst_19 = arith.constant dense<0.000000e+00> : vector<8x16xf32>
    %25 = vector.multi_reduction <add>, %24, %cst_19 [0] : vector<2x8x16xf32> to vector<8x16xf32>
    %26 = arith.addf %23, %25 : vector<8x16xf32>
    %c1_20 = arith.constant 1 : index
    %c0_21 = arith.constant 0 : index
    %c0_22 = arith.constant 0 : index
    %27 = vector.load %arg7[%c1_20, %c0_21, %c0_22] : memref<3x8x16xf32, #tpu.memory_space<vmem>>, vector<1x8x16xf32>
    %28 = vector.shape_cast %27 : vector<1x8x16xf32> to vector<8x16xf32>
    %29 = vector.shape_cast %26 : vector<8x16xf32> to vector<1x8x16xf32>
    tpu.vector_store %arg7[%c1_20, %c0_21, %c0_22], %29 {strides = array<i32>} : memref<3x8x16xf32, #tpu.memory_space<vmem>>, vector<1x8x16xf32>,
    %c2 = arith.constant 2 : index
    %c0_23 = arith.constant 0 : index
    %c0_24 = arith.constant 0 : index
    %30 = vector.load %arg7[%c2, %c0_23, %c0_24] : memref<3x8x16xf32, #tpu.memory_space<vmem>>, vector<1x8x16xf32>
    %31 = vector.shape_cast %30 : vector<1x8x16xf32> to vector<8x16xf32>
    %32 = arith.mulf %13, %6 : vector<16x16xf32>
    %33 = vector.shape_cast %32 : vector<16x16xf32> to vector<2x8x16xf32>
    %cst_25 = arith.constant dense<0.000000e+00> : vector<8x16xf32>
    %34 = vector.multi_reduction <add>, %33, %cst_25 [0] : vector<2x8x16xf32> to vector<8x16xf32>
    %35 = arith.addf %31, %34 : vector<8x16xf32>
    %c2_26 = arith.constant 2 : index
    %c0_27 = arith.constant 0 : index
    %c0_28 = arith.constant 0 : index
    %36 = vector.load %arg7[%c2_26, %c0_27, %c0_28] : memref<3x8x16xf32, #tpu.memory_space<vmem>>, vector<1x8x16xf32>
    %37 = vector.shape_cast %36 : vector<1x8x16xf32> to vector<8x16xf32>
    %38 = vector.shape_cast %35 : vector<8x16xf32> to vector<1x8x16xf32>
    tpu.vector_store %arg7[%c2_26, %c0_27, %c0_28], %38 {strides = array<i32>} : memref<3x8x16xf32, #tpu.memory_space<vmem>>, vector<1x8x16xf32>,
    %c0_i32_29 = arith.constant 0 : i32
    %39 = arith.cmpi eq, %arg1, %c0_i32_29 : i32
    %40 = arith.extui %39 : i1 to i32
    %c0_i32_30 = arith.constant 0 : i32
    %41 = arith.cmpi ne, %40, %c0_i32_30 : i32
    scf.if %41 {
      %c0_31 = arith.constant 0 : index
      %c0_32 = arith.constant 0 : index
      %c0_33 = arith.constant 0 : index
      %42 = vector.load %arg7[%c0_31, %c0_32, %c0_33] : memref<3x8x16xf32, #tpu.memory_space<vmem>>, vector<1x8x16xf32>
      %43 = vector.shape_cast %42 : vector<1x8x16xf32> to vector<8x16xf32>
      %44 = vector.shape_cast %43 : vector<8x16xf32> to vector<1x8x16xf32>
      %cst_34 = arith.constant dense<0.000000e+00> : vector<1xf32>
      %45 = vector.multi_reduction <add>, %44, %cst_34 [1, 2] : vector<1x8x16xf32> to vector<1xf32>
      %46 = vector.shape_cast %45 : vector<1xf32> to vector<1x1x1xf32>
      %47 = vector.extract %46[0, 0, 0] : f32 from vector<1x1x1xf32>
      %48 = vector.broadcast %47 : f32 to vector<1x1x1xf32>
      %c0_35 = arith.constant 0 : index
      %c0_36 = arith.constant 0 : index
      %c0_37 = arith.constant 0 : index
      %49 = vector.load %arg4[%c0_35, %c0_36, %c0_37] : memref<1x1x1xf32, #tpu.memory_space<vmem>>, vector<1x1x1xf32>
      tpu.vector_store %arg4[%c0_35, %c0_36, %c0_37], %48 {strides = array<i32>} : memref<1x1x1xf32, #tpu.memory_space<vmem>>, vector<1x1x1xf32>,
      %c1_38 = arith.constant 1 : index
      %c0_39 = arith.constant 0 : index
      %c0_40 = arith.constant 0 : index
      %50 = vector.load %arg7[%c1_38, %c0_39, %c0_40] : memref<3x8x16xf32, #tpu.memory_space<vmem>>, vector<1x8x16xf32>
      %51 = vector.shape_cast %50 : vector<1x8x16xf32> to vector<8x16xf32>
      %52 = vector.shape_cast %51 : vector<8x16xf32> to vector<1x8x16xf32>
      %cst_41 = arith.constant dense<0.000000e+00> : vector<1xf32>
      %53 = vector.multi_reduction <add>, %52, %cst_41 [1, 2] : vector<1x8x16xf32> to vector<1xf32>
      %54 = vector.shape_cast %53 : vector<1xf32> to vector<1x1x1xf32>
      %55 = vector.extract %54[0, 0, 0] : f32 from vector<1x1x1xf32>
      %56 = vector.broadcast %55 : f32 to vector<1x1x1xf32>
      %c0_42 = arith.constant 0 : index
      %c0_43 = arith.constant 0 : index
      %c0_44 = arith.constant 0 : index
      %57 = vector.load %arg5[%c0_42, %c0_43, %c0_44] : memref<1x1x1xf32, #tpu.memory_space<vmem>>, vector<1x1x1xf32>
      tpu.vector_store %arg5[%c0_42, %c0_43, %c0_44], %56 {strides = array<i32>} : memref<1x1x1xf32, #tpu.memory_space<vmem>>, vector<1x1x1xf32>,
      %c2_45 = arith.constant 2 : index
      %c0_46 = arith.constant 0 : index
      %c0_47 = arith.constant 0 : index
      %58 = vector.load %arg7[%c2_45, %c0_46, %c0_47] : memref<3x8x16xf32, #tpu.memory_space<vmem>>, vector<1x8x16xf32>
      %59 = vector.shape_cast %58 : vector<1x8x16xf32> to vector<8x16xf32>
      %60 = vector.shape_cast %59 : vector<8x16xf32> to vector<1x8x16xf32>
      %cst_48 = arith.constant dense<0.000000e+00> : vector<1xf32>
      %61 = vector.multi_reduction <add>, %60, %cst_48 [1, 2] : vector<1x8x16xf32> to vector<1xf32>
      %62 = vector.shape_cast %61 : vector<1xf32> to vector<1x1x1xf32>
      %63 = vector.extract %62[0, 0, 0] : f32 from vector<1x1x1xf32>
      %64 = vector.broadcast %63 : f32 to vector<1x1x1xf32>
      %c0_49 = arith.constant 0 : index
      %c0_50 = arith.constant 0 : index
      %c0_51 = arith.constant 0 : index
      %65 = vector.load %arg6[%c0_49, %c0_50, %c0_51] : memref<1x1x1xf32, #tpu.memory_space<vmem>>, vector<1x1x1xf32>
      tpu.vector_store %arg6[%c0_49, %c0_50, %c0_51], %64 {strides = array<i32>} : memref<1x1x1xf32, #tpu.memory_space<vmem>>, vector<1x1x1xf32>,
    } else {
    }
    return
  }
  func.func @transform_0(%arg0: i32, %arg1: i32) -> (i32, i32, i32, i32) {
    %c0_i32 = arith.constant 0 : i32
    %c0_i32_0 = arith.constant 0 : i32
    %c0_i32_1 = arith.constant 0 : i32
    return %arg0, %c0_i32, %arg1, %c0_i32_0 : i32, i32, i32, i32
  }
  func.func @transform_1(%arg0: i32, %arg1: i32) -> (i32, i32, i32, i32) {
    %c0_i32 = arith.constant 0 : i32
    %c0_i32_0 = arith.constant 0 : i32
    %c0_i32_1 = arith.constant 0 : i32
    return %arg0, %c0_i32, %arg1, %c0_i32_0 : i32, i32, i32, i32
  }
  func.func @transform_2(%arg0: i32, %arg1: i32) -> (i32, i32, i32) {
    %c0_i32 = arith.constant 0 : i32
    %c0_i32_0 = arith.constant 0 : i32
    %c0_i32_1 = arith.constant 0 : i32
    return %arg0, %c0_i32, %c0_i32_0 : i32, i32, i32
  }
  func.func @transform_3(%arg0: i32, %arg1: i32) -> (i32, i32, i32) {
    %c0_i32 = arith.constant 0 : i32
    %c0_i32_0 = arith.constant 0 : i32
    %c0_i32_1 = arith.constant 0 : i32
    return %arg0, %c0_i32, %c0_i32_0 : i32, i32, i32
  }
  func.func @transform_4(%arg0: i32, %arg1: i32) -> (i32, i32, i32) {
    %c0_i32 = arith.constant 0 : i32
    %c0_i32_0 = arith.constant 0 : i32
    %c0_i32_1 = arith.constant 0 : i32
    return %arg0, %c0_i32, %c0_i32_0 : i32, i32, i32
  }
}

</mosaic_0001>

<bundles_post_ra>
// kernel: tpu_custom_call.1
= control target key start
LH: loop header
LB: loop body
LE: loop exit
PB: predicated region body
PF: predicated region fallthrough
CT: control target
= control target key end

     0   :  { %10 = vsyncpa [#allocation4], 0  ;;  %s904_s0 = inlined_call_operand.hbm [shape: f32[2,4,16,16], index: 0, kind: input, shape index: {}]   ;;  %s905_s1 = inlined_call_operand.hbm [shape: f32[2,4,16,16], index: 1, kind: input, shape index: {}]   ;;  %s906_s2 = inlined_call_operand.vmem [shape: f32[2,1,1], index: 2, kind: output, shape index: {0}]   ;;  %s907_s3 = inlined_call_operand.vmem [shape: f32[2,1,1], index: 3, kind: output, shape index: {1}]   ;;  %s908_s4 = inlined_call_operand.vmem [shape: f32[2,1,1], index: 4, kind: output, shape index: {2}]  }
   0x1   :  { %12 = vsyncpa [#allocation4 + $0x1], 0 }
   0x2   :  { %13 = vsyncpa [#allocation6], 0 }
   0x3   :  { %15 = vsyncpa [#allocation6 + $0x1], 0  ;;  %s757_s15 = smov 0   ;;  %s759_s16 = smov 0  }
   0x4   :  { %s761_s17 = smov 0   ;;  %s763_s18 = smov 0  }
   0x5   :  { %s765_s19 = smov 0   ;;  %s767_s20 = smov 0  }
   0x6 LB: > { %s525_s21 = sadd.s32 4294967295, %s725_s20   ;;  %s33_s22 = sadd.s32 1, %s721_s19  ;;  %s725_s20 = sphi %s767_s20, %s21_s20   ;;  %s721_s19 = sphi %s765_s19, %s917_s19   ;;  %s717_s18 = sphi %s763_s18, %s916_s18   ;;  %s713_s17 = sphi %s761_s17, %s915_s17   ;;  %s709_s16 = sphi %s759_s16, %s914_s16   ;;  %s705_s15 = sphi %s757_s15, %s913_s15  }
   0x7   : > { %p35_p0 = scmp.ge.s32.totalorder %s33_s22, 2  ;;  %s42_s23 = sadd.s32 1, %s713_s17 }
   0x8   : > { %p49_p1 = scmp.ne.s32.totalorder %s713_s17, %s709_s16  ;;  %p50_p2 = scmp.eq.s32.totalorder %s725_s20, 0 }
   0x9   : > { %s919_s22 = smov (%p35_p0, %s33_s22), 0  ;;  %p55_p4 = scmp.ne.s32.totalorder %s709_s16, %s705_s15 }
   0xa   : > { %p793_p3 = por %p50_p2, %p49_p1  ;;  %s37_s25 = ssub.s32 %s721_s19, %s919_s22 }
   0xb   : > { %p56_p5 = scmp.eq.s32.totalorder %s525_s21, 0  ;;  %p40_p6 = scmp.eq.s32.totalorder %s37_s25, 0 }
   0xc   : > { %p559_p8 = scmp.lt.s32.totalorder %s725_s20, 2  ;;  %s809_s28 = sand.u32 1, %s713_s17  }
   0xd   : > { %p800_p7 = por %p56_p5, %p55_p4  ;;  %s540_s29 = sshll.u32 %s721_s19, 10 }
   0xe   : > { %s806_s27 = scalar_select %p40_p6, %s713_s17, %s42_s23  }
   0xf   : > { %s529_s30 = sshll.u32 %s809_s28, 4  ;;  %s197_s7 = scalar_lea.hbm %s904_s0, %s540_s29 }
  0x10   : > { %s189_s8 = scalar_lea.vmem [#allocation3], %s529_s30  ;;  %p820_p9 = pnand %p559_p8, %p793_p3 }
  0x11   : > { %s198_s9 = sshll.u32 %s189_s8, 4  ;;  %s186_s11 = scalar_lea.sflag [#allocation4], %s809_s28  ;;  %s199_s9 = int_to_ptr.vmem [resolvable:$true] %s198_s9 }
  0x12   : > { %p617_p10 = pneg %p820_p9  ;;  %s628_s12 = scalar_lea.vmem %s199_s9, 256 }
  0x13   : > { %p629_p11 = scmp.ne.s32.totalorder %s199_s9, %s628_s12  ;;  %s727_s13 = smov [#allocation3]  }
  0x14   : > { %s633_s14 = sshll.u32 %s727_s13, 4  ;;  %s634_s14 = int_to_ptr.vmem [resolvable:$false] %s633_s14 }
  0x15   : > { %p631_p12 = pnand %p629_p11, %p617_p10  ;;  %s635_s15 = scalar_lea.vmem %s634_s14, 512 }
  0x16   : > { %p636_p0 = scmp.lt.s32.totalorder %s199_s9, %s634_s14  ;;  %p637_p1 = scmp.lt.s32.totalorder %s635_s15, %s628_s12 }
  0x17   : > { %p632_p13 = pneg %p631_p12 }
  0x18   : > { %p638_p2 = por %p637_p1, %p636_p0 }
  0x1a   : > { %p639_p3 = pnand %p638_p2, %p632_p13 }
  0x1c   : > { %642 = shalt.err (!%p639_p3)
}
  0x1d   : > { %s728_s21 = smov 128   ;;  %s729_s23 = smov 8  }
  0x1e   : > { %555 = dma.hbm_to_vmem [thread:$0]  (!%p820_p9), %s197_s7, 256, %s199_s9, %s186_s11, %s728_s21, %s728_s21, %s729_s23  }
  0x1f   : > { %p535_p4 = scmp.ge.s32.totalorder %s725_s20, 1  ;;  %p229_p5 = scmp.lt.s32.totalorder %s725_s20, 3 }
  0x20   : > { %s220_s6 = scalar_lea.hbm %s905_s1, %s540_s29  ;;  %s212_s8 = scalar_lea.vmem [#allocation5], %s529_s30 }
  0x21   : > { %p834_p6 = pnand %p535_p4, %p229_p5  ;;  %s221_s12 = sshll.u32 %s212_s8, 4  ;;  %s222_s12 = int_to_ptr.vmem [resolvable:$true] %s221_s12 }
  0x22   : > { %s209_s13 = scalar_lea.sflag [#allocation6], %s809_s28  ;;  %s656_s14 = scalar_lea.vmem %s222_s12, 256 }
  0x23   : > { %p657_p8 = scmp.ne.s32.totalorder %s222_s12, %s656_s14  ;;  %s730_s7 = smov [#allocation5]  }
  0x24   : > { %s661_s9 = sshll.u32 %s730_s7, 4  ;;  %s662_s9 = int_to_ptr.vmem [resolvable:$false] %s661_s9 }
  0x25   : > { %p659_p11 = pnand %p657_p8, %p617_p10  ;;  %s663_s11 = scalar_lea.vmem %s662_s9, 512 }
  0x26   : > { %p664_p13 = scmp.lt.s32.totalorder %s222_s12, %s662_s9  ;;  %p665_p0 = scmp.lt.s32.totalorder %s663_s11, %s656_s14 }
  0x27   : > { %p660_p12 = pneg %p659_p11 }
  0x28   : > { %p666_p1 = por %p665_p0, %p664_p13 }
  0x2a   : > { %p667_p2 = pnand %p666_p1, %p660_p12 }
  0x2c   : > { %670 = shalt.err (!%p667_p2)
}
  0x2d   : > { %558 = dma.hbm_to_vmem [thread:$0]  (!%p820_p9), %s220_s6, 256, %s222_s12, %s209_s13, %s728_s21, %s728_s21, %s729_s23  }
  0x2e   : > { %233 = sbr.rel (%p834_p6) target bundleno = 295 (0x127), region = 28  ;;  %s235_s28 = sand.u32 (!%p834_p6), 1, %s709_s16  }
  0x2f   : > { %s536_s29 = sshll.u32 (!%p834_p6), %s235_s28, 4  ;;  %s236_s30 = scalar_lea.sflag (!%p834_p6), [#allocation4], %s235_s28 }
  0x30   : > { %s239_s15 = scalar_lea.vmem (!%p834_p6), [#allocation3], %s536_s29 }
  0x33   : > { %696 = dma.done.wait (%p800_p7), %s236_s30, 256  }
  0x34   : > { %698 = vsyncadd (%p800_p7), %s236_s30, 4294967040  ;;  %s245_s25 = scalar_lea.sflag [#allocation6], %s235_s28  ;;  %s248_s5 = scalar_lea.vmem [#allocation5], %s536_s29 }
  0x35   : > { %700 = dma.done.wait (%p800_p7), %s245_s25, 256  }
  0x36   : > { %702 = vsyncadd (%p800_p7), %s245_s25, 4294967040  ;;  %vm297_vm0 = vcmask 130048   ;;  %v731_v0 = vmov 0.0   ;;  %v303_v1 = vld [vmem:[%s248_s5] sm:$0xff]  ;;  %v304_v2 = vld [vmem:[%s248_s5 + $0x8] sm:$0xff]  ;;  %p284_p7 = scmp.lt.s32.totalorder %s717_s18, 1 }
  0x37   : > { %298 = vst.msk [vmem:[#allocation2] sm:$0xff] %vm297_vm0, %v731_v0  ;;  %299 = vst.msk [vmem:[#allocation2 + $0x8] sm:$0xff] %vm297_vm0, %v731_v0  ;;  %v301_v3 = vld [vmem:[%s239_s15] sm:$0xff]  ;;  %v315_v5 = vsel %vm297_vm0, %v303_v1, 0.0  ;;  %v316_v6 = vsel %vm297_vm0, %v304_v2, 0.0  ;;  %v302_v7 = vld [vmem:[%s239_s15 + $0x8] sm:$0xff] }
  0x38   : > { %300 = vst.msk [vmem:[#allocation2 + $0x10] sm:$0xff] %vm297_vm0, %v731_v0  ;;  %v305_v8 = vmul.f32 0.5, %v301_v3  ;;  %v317_v9 = vadd.f32 %v316_v6, %v315_v5  ;;  %v306_v10 = vmul.f32 0.5, %v302_v7  ;;  %s921_s18 = smov (!%p284_p7, %s717_s18), 1  ;;  %vm351_vm1 = vcmask 0  }
  0x39   : > { %s286_s21 = scalar_lea.vmem %s906_s2, %s921_s18  ;;  %s289_s8 = scalar_lea.vmem %s907_s3, %s921_s18 }
  0x3a   : > { %611 = vtanh.f32 %v305_v8  ;;  %s292_s7 = scalar_lea.vmem %s908_s4, %s921_s18 }
  0x3b   : > { %613 = vtanh.f32 %v306_v10 }
  0x3e   : > { %v313_v4 = vld [vmem:[#allocation2] sm:$0xff]  ;;  %v321_v22 = vld [vmem:[#allocation2 + $0x8] sm:$0xff] }
  0x3f   : > { %v318_v11 = vadd.f32 %v317_v9, %v313_v4  ;;  %v328_v27 = vld [vmem:[#allocation2 + $0x10] sm:$0xff] }
  0x41   : > { %319 = vst.msk [vmem:[#allocation2] sm:$0xff] %vm297_vm0, %v318_v11 }
  0x47   : > { %v612_v14 = vpop.eup %611 }
  0x48   : > { %v339_v12 = vld [vmem:[#allocation2] sm:$0xff]  ;;  %v614_v15 = vpop.eup %613  ;;  %v309_v16 = vmul.f32 0.5, %v612_v14 }
  0x49   : > { %v340_v13 = vsel %vm297_vm0, %v339_v12, 0.0  ;;  %v310_v17 = vmul.f32 0.5, %v614_v15 }
  0x4a   : > { %341 = vadd.xlane.f32.xlu0 %v340_v13  ;;  %v311_v18 = vadd.f32 0.5, %v309_v16 }
  0x4b   : > { %v312_v19 = vadd.f32 0.5, %v310_v17 }
  0x4c   : > { %v322_v20 = vsel %vm297_vm0, %v311_v18, 0.0  ;;  %v329_v21 = vmul.f32 %v311_v18, %v303_v1 }
  0x4d   : > { %v323_v23 = vsel %vm297_vm0, %v312_v19, 0.0  ;;  %v330_v24 = vmul.f32 %v312_v19, %v304_v2 }
  0x4e   : > { %v324_v25 = vadd.f32 %v323_v23, %v322_v20  ;;  %v331_v26 = vsel %vm297_vm0, %v329_v21, 0.0 }
  0x4f   : > { %v332_v28 = vsel %vm297_vm0, %v330_v24, 0.0 }
  0x50   : > { %v325_v29 = vadd.f32 %v324_v25, %v321_v22  ;;  %v333_v30 = vadd.f32 %v332_v28, %v331_v26 }
  0x52   : > { %326 = vst.msk [vmem:[#allocation2 + $0x8] sm:$0xff] %vm297_vm0, %v325_v29  ;;  %v334_v31 = vadd.f32 %v333_v30, %v328_v27 }
  0x54   : > { %335 = vst.msk [vmem:[#allocation2 + $0x10] sm:$0xff] %vm297_vm0, %v334_v31 }
  0x59   : > { %v353_v32 = vld [vmem:[#allocation2 + $0x8] sm:$0xff] }
  0x5a   : > { %v354_v33 = vsel %vm297_vm0, %v353_v32, 0.0 }
  0x5b   : > { %355 = vadd.xlane.f32.xlu0 %v354_v33  ;;  %v366_v34 = vld [vmem:[#allocation2 + $0x10] sm:$0xff] }
  0x5c   : > { %v367_v35 = vsel %vm297_vm0, %v366_v34, 0.0 }
  0x5d   : > { %368 = vadd.xlane.f32.xlu1 %v367_v35 }
  0xd3   : > { %v342_v36 = vpop.xlane.xlu0 %341 }
  0xd4   : > { %v343_v37 = vrot.slane %v342_v36, 4 }
  0xd6   : > { %v344_v38 = vadd.f32 %v343_v37, %v342_v36 }
  0xd8   : > { %v345_v39 = vrot.slane %v344_v38, 2 }
  0xda   : > { %v346_v40 = vadd.f32 %v345_v39, %v344_v38 }
  0xdc   : > { %v347_v41 = vrot.slane %v346_v40, 1 }
  0xde   : > { %v348_v42 = vadd.f32 %v347_v41, %v346_v40 }
  0xe0   : > { %542 = vpush %v348_v42 }
  0xe4   : > { %v356_v43 = vpop.xlane.xlu0 %355 }
  0xe5   : > { %v357_v44 = vrot.slane %v356_v43, 4 }
  0xe6   : > { %v369_v45 = vpop.xlane.xlu1 %368 }
  0xe7   : > { %v358_v46 = vadd.f32 %v357_v44, %v356_v43  ;;  %v370_v47 = vrot.slane %v369_v45, 4 }
  0xe9   : > { %v359_v48 = vrot.slane %v358_v46, 2  ;;  %v371_v49 = vadd.f32 %v370_v47, %v369_v45 }
  0xeb   : > { %v360_v50 = vadd.f32 %v359_v48, %v358_v46  ;;  %v372_v51 = vrot.slane %v371_v49, 2 }
  0xed   : > { %v373_v52 = vadd.f32 %v372_v51, %v371_v49  ;;  %v361_v53 = vrot.slane %v360_v50, 1 }
  0xef   : > { %v362_v54 = vadd.f32 %v361_v53, %v360_v50  ;;  %v374_v55 = vrot.slane %v373_v52, 1 }
  0xf1   : > { %544 = vpush %v362_v54  ;;  %v375_v56 = vadd.f32 %v374_v55, %v373_v52 }
  0xf3   : > { %546 = vpush %v375_v56 }
 0x111   : > { %s543_s23 = spop %542 }
 0x112   : > { %v350_v57 = vstv %s543_s23 }
 0x113   : > { %352 = vst.msk [vmem:[%s286_s21] sm:$0x1] %vm351_vm1, %v350_v57 }
 0x122   : > { %s545_s12 = spop %544 }
 0x123   : > { %v364_v58 = vstv %s545_s12 }
 0x124   : > { %365 = vst.msk [vmem:[%s289_s8] sm:$0x1] %vm351_vm1, %v364_v58  ;;  %s547_s9 = spop %546 }
 0x125   : > { %v377_v59 = vstv %s547_s9 }
 0x126   : > { %378 = vst.msk [vmem:[%s292_s7] sm:$0x1] %vm351_vm1, %v377_v59 }
 0x127 PF: > { %s21_s20 = sadd.s32 1, %s725_s20   ;;  %s913_s15 = smov %s709_s16 }
 0x128   : > { %p18_p9 = scmp.ge.s32.totalorder %s21_s20, 4   ;;  %s914_s16 = smov %s713_s17 }
 0x129   : > { %s915_s17 = smov %s806_s27  ;;  %s916_s18 = smov %s721_s19 }
 0x12a   : > { %s917_s19 = smov %s919_s22  ;;  %20 = sbr.rel (!%p18_p9) target bundleno = 6 (0x6), region = 115 }
 0x12f   :  { %420 = vsyncpa [#allocation4], 1 }
 0x130   :  { %422 = vsyncpa [#allocation4 + $0x1], 1 }
 0x131   :  { %423 = vsyncpa [#allocation6], 1 }
 0x132   :  { %425 = vsyncpa [#allocation6 + $0x1], 1 }

</bundles_post_ra>
